<compile_context>
chip_gen: v7x
topology: tpu7x:2x2x1
jax: 0.10.0
libtpu: 0.0.40
codegen_flags: <defaults>
</compile_context>

<pallas_src>
import jax
import jax.numpy as jnp
from jax.experimental import pallas as pl
from jax.experimental.pallas import tpu as pltpu


def _round_up(n, m):
    return (n + m - 1) // m * m


def autoencoder_kernel(x_ref, wg_ref, bg_ref, wh_ref, bh_ref, out_ref):
    """One batch tile: two bf16 MXU matmuls + f32 bias/sigmoid epilogues."""
    # x arrives as f32 straight from HBM (no wrapper cast pass); cast to bf16
    # in-register for the MXU.
    x = x_ref[...].astype(jnp.bfloat16)                       # (bt, nq)

    # Encoder: z1 = x @ Wg + bg  (bf16 MXU inputs, f32 accumulate/epilogue).
    z1 = jnp.dot(x, wg_ref[...], preferred_element_type=jnp.float32) + bg_ref[...]
    # sigmoid(z) = 0.5 * tanh(0.5 z) + 0.5  -> single EUP op per element.
    h1 = 0.5 * jnp.tanh(0.5 * z1) + 0.5

    # Decoder: z2 = h1 @ Wh + bh.
    z2 = jnp.dot(h1.astype(jnp.bfloat16), wh_ref[...],
                 preferred_element_type=jnp.float32) + bh_ref[...]
    out_ref[...] = (0.5 * jnp.tanh(0.5 * z2) + 0.5).astype(out_ref.dtype)


def _vmem_footprint(bt, nq, k_p, out_bytes):
    """Conservative per-step VMEM estimate, including in-kernel temporaries."""
    x_stream = 2 * bt * nq * 4            # double-buffered f32 input tiles
    out_stream = 2 * bt * nq * out_bytes  # double-buffered output tiles
    weights = 2 * nq * k_p * 2            # Wg + Wh, bf16, single-buffered
    biases = (k_p + nq) * 4               # bg + bh, f32, single-buffered
    # temporaries: x bf16 copy, z2 f32, pre-cast sigmoid(z2) f32 (nq-wide);
    # z1 f32, h1 f32, h1 bf16 (k-wide).
    temps = bt * nq * (2 + 4 + 4) + bt * k_p * (4 + 4 + 2)
    return x_stream + out_stream + weights + biases + temps


def autoencoder_forward(x, wg, bg, wh, bh, *, batch_tile=512,
                        out_dtype=jnp.float32):
    """AutoEncoder forward pass with a Pallas TPU kernel.

    x  : (B, num_question)  user vectors (f32)
    wg : (num_question, k)  encoder weight (transposed vs torch's (k, nq))
    bg : (1, k) or (k,)     encoder bias
    wh : (k, num_question)  decoder weight (transposed vs torch's (nq, k))
    bh : (1, num_question) or (num_question,) decoder bias
    Returns (B, num_question) in `out_dtype` (f32 by default; bf16 cuts HBM
    write traffic if the consumer tolerates it).
    """
    B, nq = x.shape
    nq_w, k = wg.shape
    assert nq_w == nq and wh.shape == (k, nq), "weight shapes inconsistent with x"

    f32, bf16 = jnp.float32, jnp.bfloat16
    x = jnp.asarray(x, f32)                       # no-op if already f32
    bg = jnp.asarray(bg, f32).reshape(1, -1)
    bh = jnp.asarray(bh, f32).reshape(1, -1)
    out_bytes = jnp.dtype(out_dtype).itemsize

    # Hidden dim padded to a lane multiple (weights only -> tiny one-time copy;
    # padded h1 lanes are 0.5 but hit zero rows of Wh, so the result is exact).
    # The question dim stays unpadded: BlockSpec dims equal to the full array
    # extent are legal, so no x pad pass and no output column slice.
    k_p = _round_up(k, 128)

    # --- batch tile selection ------------------------------------------------
    # * grid >= 2 when B >= 64 so both v7x TensorCores are used,
    # * tile divides B nearly evenly (minimal last-tile padding waste),
    # * footprint (incl. temporaries) kept under a 40 MiB budget that is safe
    #   on v5e/v6e (128 MiB physical) and v7x (64 MiB physical).
    VMEM_BUDGET = 40 << 20
    n_tiles = max(pl.cdiv(B, batch_tile), 2 if B >= 64 else 1)
    while True:
        bt = max(16, _round_up(pl.cdiv(B, n_tiles), 16))
        footprint = _vmem_footprint(bt, nq, k_p, out_bytes)
        if footprint <= VMEM_BUDGET or bt <= 16:
            break
        n_tiles *= 2

    B_p = _round_up(B, bt)
    grid = (B_p // bt,)

    # Raise the scoped-VMEM limit explicitly whenever the footprint would not
    # fit v5e's 16 MiB default; cap well below v7x's 64 MiB physical VMEM.
    need = int(footprint * 1.25)
    vmem_limit = min(need, VMEM_BUDGET) if need > (12 << 20) else None

    # Padded, pre-cast weights/biases (small, one-time).  x is only touched
    # when B is ragged w.r.t. the tile.
    wg_p = jnp.zeros((nq, k_p), bf16).at[:, :k].set(wg.astype(bf16))
    bg_p = jnp.zeros((1, k_p), f32).at[:, :k].set(bg)
    wh_p = jnp.zeros((k_p, nq), bf16).at[:k, :].set(wh.astype(bf16))
    bh_p = bh
    x_in = x if B_p == B else jnp.zeros((B_p, nq), f32).at[:B].set(x)

    # Advisory scheduling hint for XLA around this custom call.
    cost = pl.CostEstimate(
        flops=4 * B_p * nq * k_p,                        # two matmuls
        transcendentals=B_p * (k_p + nq),                # one tanh per element
        bytes_accessed=(B_p * nq * (4 + out_bytes)       # x read + out write
                        + (wg_p.size + wh_p.size) * 2
                        + (bg_p.size + bh_p.size) * 4),
    )

    resident = dict(pipeline_mode=pl.Buffered(1))        # no 2nd weight copy

    out = pl.pallas_call(
        autoencoder_kernel,
        out_shape=jax.ShapeDtypeStruct((B_p, nq), out_dtype),
        grid_spec=pltpu.PrefetchScalarGridSpec(
            num_scalar_prefetch=0,
            grid=grid,
            in_specs=[
                pl.BlockSpec((bt, nq), lambda i: (i, 0)),              # x (streamed)
                pl.BlockSpec((nq, k_p), lambda i: (0, 0), **resident),  # Wg
                pl.BlockSpec((1, k_p), lambda i: (0, 0), **resident),   # bg
                pl.BlockSpec((k_p, nq), lambda i: (0, 0), **resident),  # Wh
                pl.BlockSpec((1, nq), lambda i: (0, 0), **resident),    # bh
            ],
            out_specs=pl.BlockSpec((bt, nq), lambda i: (i, 0)),
        ),
        compiler_params=pltpu.CompilerParams(
            dimension_semantics=("parallel",),
            vmem_limit_bytes=vmem_limit,
        ),
        cost_estimate=cost,
    )(x_in, wg_p, bg_p, wh_p, bh_p)

    # Only drop padding when the batch was actually padded.
    return out if B_p == B else out[:B]


def init_params(key, num_question, k):
    """Deterministic init mimicking nn.Linear's uniform fan-in init.

    Weights are returned pre-transposed for the kernel layout above.
    """
    kg_w, kg_b, kh_w, kh_b = jax.random.split(key, 4)
    bound_g = 1.0 / jnp.sqrt(num_question)
    bound_h = 1.0 / jnp.sqrt(k)
    wg = jax.random.uniform(kg_w, (num_question, k), jnp.float32, -bound_g, bound_g)
    bg = jax.random.uniform(kg_b, (1, k), jnp.float32, -bound_g, bound_g)
    wh = jax.random.uniform(kh_w, (k, num_question), jnp.float32, -bound_h, bound_h)
    bh = jax.random.uniform(kh_b, (1, num_question), jnp.float32, -bound_h, bound_h)
    return wg, bg, wh, bh


# TODO(synk): get_weight_norm() is a scalar reduction over the weights, not part
# of the forward pass; it is left to plain jnp (jnp.sum(wg**2) + jnp.sum(wh**2)).

if __name__ == "__main__":
    # k=100 is the module default (exercises the hidden-dim pad-to-128 path);
    # B=256 with batch_tile=128 -> grid=(2,) so the pipelined / two-TensorCore
    # path is exercised even at this small batch.
    B, NUM_QUESTION, K = 256, 128, 100

    key = jax.random.PRNGKey(0)
    k_x, k_params = jax.random.split(key)

    x = jax.random.uniform(k_x, (B, NUM_QUESTION), jnp.float32)  # user vectors
    wg, bg, wh, bh = init_params(k_params, NUM_QUESTION, K)

    out = autoencoder_forward(x, wg, bg, wh, bh, batch_tile=128)
    out = jax.block_until_ready(out)
    assert out.shape == (B, NUM_QUESTION)
    assert out.dtype == jnp.float32

    # Reference 1: same bf16 MXU inputs / f32 accumulation as the kernel (tight tol).
    xb, wgb, whb = (a.astype(jnp.bfloat16) for a in (x, wg, wh))
    h1 = jax.nn.sigmoid(jnp.dot(xb, wgb, preferred_element_type=jnp.float32) + bg)
    ref_bf16 = jax.nn.sigmoid(
        jnp.dot(h1.astype(jnp.bfloat16), whb, preferred_element_type=jnp.float32) + bh)
    assert jnp.allclose(out, ref_bf16, atol=1e-3, rtol=1e-3), "mismatch vs bf16 reference"

    # Reference 2: pure-f32 module semantics (loose tol covers bf16 MXU inputs).
    ref_f32 = jax.nn.sigmoid(jax.nn.sigmoid(x @ wg + bg) @ wh + bh)
    assert jnp.allclose(out, ref_f32, atol=3e-2, rtol=3e-2), "mismatch vs f32 reference"

    print("KERNEL_OK")
</pallas_src>

<mosaic_0001>
module attributes {stable_mosaic.version = 11 : i64} {
  func.func @autoencoder_kernel(%arg0: i32, %arg1: memref<128x128xf32, #tpu.memory_space<vmem>>, %arg2: memref<128x128xbf16, #tpu.memory_space<vmem>>, %arg3: memref<1x128xf32, #tpu.memory_space<vmem>>, %arg4: memref<128x128xbf16, #tpu.memory_space<vmem>>, %arg5: memref<1x128xf32, #tpu.memory_space<vmem>>, %arg6: memref<128x128xf32, #tpu.memory_space<vmem>>) attributes {dimension_semantics = [#tpu.dimension_semantics<parallel>], iteration_bounds = array<i64: 2>, scalar_prefetch = 0 : i64, scratch_operands = 0 : i64, tpu.core_type = #tpu.core_type<tc>, window_params = [{transform_indices = @transform_0, window_bounds = array<i64: 128, 128>}, {pipeline_mode = #tpu.pipeline_mode<synchronous>, transform_indices = @transform_1, window_bounds = array<i64: 128, 128>}, {pipeline_mode = #tpu.pipeline_mode<synchronous>, transform_indices = @transform_2, window_bounds = array<i64: 1, 128>}, {pipeline_mode = #tpu.pipeline_mode<synchronous>, transform_indices = @transform_3, window_bounds = array<i64: 128, 128>}, {pipeline_mode = #tpu.pipeline_mode<synchronous>, transform_indices = @transform_4, window_bounds = array<i64: 1, 128>}, {transform_indices = @transform_5, window_bounds = array<i64: 128, 128>}]} {
    %c0 = arith.constant 0 : index
    %c0_0 = arith.constant 0 : index
    %0 = vector.load %arg1[%c0, %c0_0] : memref<128x128xf32, #tpu.memory_space<vmem>>, vector<128x128xf32>
    %1 = arith.truncf %0 : vector<128x128xf32> to vector<128x128xbf16>
    %c0_1 = arith.constant 0 : index
    %c0_2 = arith.constant 0 : index
    %2 = vector.load %arg2[%c0_1, %c0_2] : memref<128x128xbf16, #tpu.memory_space<vmem>>, vector<128x128xbf16>
    %cst = arith.constant dense<0.000000e+00> : vector<128x128xf32>
    %3 = tpu.matmul %1, %2, %cst {dimension_numbers = #tpu.dot_dimension_numbers<[1], [0], [0], [1], [0, 0, 1, 1], [], []>} : vector<128x128xbf16>, vector<128x128xbf16>, vector<128x128xf32> -> vector<128x128xf32>
    %c0_3 = arith.constant 0 : index
    %c0_4 = arith.constant 0 : index
    %4 = vector.load %arg3[%c0_3, %c0_4] : memref<1x128xf32, #tpu.memory_space<vmem>>, vector<1x128xf32>
    %5 = vector.broadcast %4 : vector<1x128xf32> to vector<128x128xf32>
    %6 = arith.addf %3, %5 : vector<128x128xf32>
    %cst_5 = arith.constant 5.000000e-01 : f32
    %7 = vector.broadcast %cst_5 : f32 to vector<128x128xf32>
    %8 = arith.mulf %7, %6 : vector<128x128xf32>
    %9 = math.tanh %8 : vector<128x128xf32>
    %cst_6 = arith.constant 5.000000e-01 : f32
    %10 = vector.broadcast %cst_6 : f32 to vector<128x128xf32>
    %11 = arith.mulf %10, %9 : vector<128x128xf32>
    %cst_7 = arith.constant 5.000000e-01 : f32
    %12 = vector.broadcast %cst_7 : f32 to vector<128x128xf32>
    %13 = arith.addf %11, %12 : vector<128x128xf32>
    %14 = arith.truncf %13 : vector<128x128xf32> to vector<128x128xbf16>
    %c0_8 = arith.constant 0 : index
    %c0_9 = arith.constant 0 : index
    %15 = vector.load %arg4[%c0_8, %c0_9] : memref<128x128xbf16, #tpu.memory_space<vmem>>, vector<128x128xbf16>
    %cst_10 = arith.constant dense<0.000000e+00> : vector<128x128xf32>
    %16 = tpu.matmul %14, %15, %cst_10 {dimension_numbers = #tpu.dot_dimension_numbers<[1], [0], [0], [1], [0, 0, 1, 1], [], []>} : vector<128x128xbf16>, vector<128x128xbf16>, vector<128x128xf32> -> vector<128x128xf32>
    %c0_11 = arith.constant 0 : index
    %c0_12 = arith.constant 0 : index
    %17 = vector.load %arg5[%c0_11, %c0_12] : memref<1x128xf32, #tpu.memory_space<vmem>>, vector<1x128xf32>
    %18 = vector.broadcast %17 : vector<1x128xf32> to vector<128x128xf32>
    %19 = arith.addf %16, %18 : vector<128x128xf32>
    %cst_13 = arith.constant 5.000000e-01 : f32
    %20 = vector.broadcast %cst_13 : f32 to vector<128x128xf32>
    %21 = arith.mulf %20, %19 : vector<128x128xf32>
    %22 = math.tanh %21 : vector<128x128xf32>
    %cst_14 = arith.constant 5.000000e-01 : f32
    %23 = vector.broadcast %cst_14 : f32 to vector<128x128xf32>
    %24 = arith.mulf %23, %22 : vector<128x128xf32>
    %cst_15 = arith.constant 5.000000e-01 : f32
    %25 = vector.broadcast %cst_15 : f32 to vector<128x128xf32>
    %26 = arith.addf %24, %25 : vector<128x128xf32>
    %c0_16 = arith.constant 0 : index
    %c0_17 = arith.constant 0 : index
    %27 = vector.load %arg6[%c0_16, %c0_17] : memref<128x128xf32, #tpu.memory_space<vmem>>, vector<128x128xf32>
    tpu.vector_store %arg6[%c0_16, %c0_17], %26 {strides = array<i32>} : memref<128x128xf32, #tpu.memory_space<vmem>>, vector<128x128xf32>,
    return
  }
  func.func @transform_0(%arg0: i32) -> (i32, i32) {
    %c0_i32 = arith.constant 0 : i32
    %c0_i32_0 = arith.constant 0 : i32
    return %arg0, %c0_i32 : i32, i32
  }
  func.func @transform_1(%arg0: i32) -> (i32, i32) {
    %c0_i32 = arith.constant 0 : i32
    %c0_i32_0 = arith.constant 0 : i32
    %c0_i32_1 = arith.constant 0 : i32
    return %c0_i32, %c0_i32_0 : i32, i32
  }
  func.func @transform_2(%arg0: i32) -> (i32, i32) {
    %c0_i32 = arith.constant 0 : i32
    %c0_i32_0 = arith.constant 0 : i32
    %c0_i32_1 = arith.constant 0 : i32
    return %c0_i32, %c0_i32_0 : i32, i32
  }
  func.func @transform_3(%arg0: i32) -> (i32, i32) {
    %c0_i32 = arith.constant 0 : i32
    %c0_i32_0 = arith.constant 0 : i32
    %c0_i32_1 = arith.constant 0 : i32
    return %c0_i32, %c0_i32_0 : i32, i32
  }
  func.func @transform_4(%arg0: i32) -> (i32, i32) {
    %c0_i32 = arith.constant 0 : i32
    %c0_i32_0 = arith.constant 0 : i32
    %c0_i32_1 = arith.constant 0 : i32
    return %c0_i32, %c0_i32_0 : i32, i32
  }
  func.func @transform_5(%arg0: i32) -> (i32, i32) {
    %c0_i32 = arith.constant 0 : i32
    %c0_i32_0 = arith.constant 0 : i32
    return %arg0, %c0_i32 : i32, i32
  }
}

</mosaic_0001>

<bundles_post_ra>
// kernel: tpu_custom_call.1
= control target key start
LH: loop header
LB: loop body
LE: loop exit
PB: predicated region body
PF: predicated region fallthrough
CT: control target
= control target key end

     0   :  { %10 = vsyncpa [#allocation3], 0  ;;  %s1695_s0 = inlined_call_operand.hbm [shape: f32[256,128], index: 0, kind: input, shape index: {}]   ;;  %s1696_s1 = inlined_call_operand.hbm [shape: bf16[128,128], index: 1, kind: input, shape index: {}]   ;;  %s1697_s2 = inlined_call_operand.vmem [shape: f32[1,128], index: 2, kind: input, shape index: {}]   ;;  %s1698_s3 = inlined_call_operand.hbm [shape: bf16[128,128], index: 3, kind: input, shape index: {}]   ;;  %s1699_s4 = inlined_call_operand.vmem [shape: f32[1,128], index: 4, kind: input, shape index: {}]   ;;  %s1700_s5 = inlined_call_operand.hbm [shape: f32[256,128], index: 5, kind: output, shape index: {}]  }
   0x1   :  { %12 = vsyncpa [#allocation3 + $0x1], 0 }
   0x2   :  { %13 = vsyncpa [#allocation6], 0 }
   0x3   :  { %14 = vsyncpa [#allocation4], 0 }
   0x4   :  { %16 = vsyncpa [#allocation4 + $0x1], 0  ;;  %s1378_s18 = smov 0   ;;  %s1380_s19 = smov 0  }
   0x5   :  { %s1382_s20 = smov 0   ;;  %s1384_s21 = smov 0  }
   0x6 LB: > { %s1399_s22 = sadd.s32 4294967295, %s1336_s21   ;;  %s893_s23 = sadd.s32 4294967294, %s1336_s21   ;;  %s1336_s21 = sphi %s1384_s21, %s1720_s21   ;;  %s1332_s20 = sphi %s1382_s20, %s1719_s20   ;;  %s1328_s19 = sphi %s1380_s19, %s1718_s19   ;;  %s1324_s18 = sphi %s1378_s18, %s1717_s18  }
   0x7   : > { %p42_p0 = scmp.ne.s32.totalorder %s1328_s19, %s1324_s18  ;;  %p1701_p1 = scmp.eq.s32.totalorder %s1399_s22, 0 }
   0x8   : > { %p156_p3 = scmp.eq.s32.totalorder %s893_s23, 1  ;;  %p894_p5 = scmp.ge.s32.totalorder %s1336_s21, 1 }
   0x9   : > { %p1408_p4 = por %p1701_p1, %p42_p0  ;;  %p163_p7 = scmp.lt.s32.totalorder %s1336_s21, 3 }
   0xa   : > { %p1413_p6 = por %p156_p3, %p42_p0  ;;  %s1338_s27 = smov [#allocation5]  }
   0xb   : > { %s1704_s24 = scalar_select %p1408_p4, 1, 0 }
   0xc   : > { %s1705_s25 = scalar_select %p1413_p6, 1, 0 }
   0xd   : > { %p1418_p8 = pnand %p894_p5, %p163_p7  ;;  %s175_s28 = sshll.u32 %s1338_s27, 4  ;;  %s1422_s28 = int_to_ptr.vmem [resolvable:$true] %s175_s28 }
   0xe   : > { %s1339_s30 = smov [#allocation7]   ;;  %s1180_s9 = scalar_lea.hbm %s1696_s1, 1024 }
   0xf   : > { %p1039_p9 = pneg %p1418_p8  ;;  %s191_s6 = sshll.u32 %s1339_s30, 4  ;;  %s1433_s6 = int_to_ptr.vmem [resolvable:$true] %s191_s6 }
  0x10   : > { %p1181_p12 = scmp.ne.s32.totalorder %s1696_s1, %s1180_s9  ;;  %p1187_p5 = scmp.lt.u32.totalorder %s1180_s9, %s1696_s1 }
  0x11   : > { %p1429_p11 = pnand %p1039_p9, %p1701_p1 }
  0x13   : > { %p1182_p13 = pneg %p1429_p11 }
  0x15   : > { %p1183_p0 = pnand %p1182_p13, %p1181_p12 }
  0x17   : > { %p1184_p3 = pneg %p1183_p0 }
  0x19   : > { %p1189_p7 = pnand %p1187_p5, %p1184_p3 }
  0x1b   : > { %1192 = shalt.err (!%p1189_p7)
}
  0x1c   : > { %s1193_s14 = scalar_lea.vmem %s1422_s28, 1024  ;;  %p1201_p2 = scmp.lt.s32.totalorder %s1422_s28, %s1422_s28 }
  0x1d   : > { %p1194_p9 = scmp.ne.s32.totalorder %s1422_s28, %s1193_s14  ;;  %p1202_p12 = scmp.lt.s32.totalorder %s1193_s14, %s1193_s14 }
  0x1f   : > { %p1196_p10 = pnand %p1194_p9, %p1182_p13  ;;  %p1203_p0 = por %p1202_p12, %p1201_p2 }
  0x21   : > { %p1197_p1 = pneg %p1196_p10 }
  0x23   : > { %p1204_p6 = pnand %p1203_p0, %p1197_p1 }
  0x25   : > { %1207 = shalt.err (!%p1204_p6)
}
  0x26   : > { %s1340_s15 = smov 64   ;;  %s1341_s16 = smov 4  }
  0x27   : > { %1042 = dma.hbm_to_vmem [thread:$0]  (!%p1429_p11), %s1696_s1, 1024, %s1422_s28, [#allocation6], %s1340_s15, %s1340_s15, %s1341_s16  }
  0x28   : > { %s1208_s7 = scalar_lea.hbm %s1698_s3, 1024 }
  0x29   : > { %p1209_p2 = scmp.ne.s32.totalorder %s1698_s3, %s1208_s7  ;;  %p1215_p10 = scmp.lt.u32.totalorder %s1208_s7, %s1698_s3 }
  0x2b   : > { %p1211_p1 = pnand %p1209_p2, %p1182_p13 }
  0x2d   : > { %p1212_p6 = pneg %p1211_p1 }
  0x2f   : > { %p1217_p3 = pnand %p1215_p10, %p1212_p6 }
  0x31   : > { %1220 = shalt.err (!%p1217_p3)
}
  0x32   : > { %s1221_s28 = scalar_lea.vmem %s1433_s6, 1024  ;;  %p1229_p12 = scmp.lt.s32.totalorder %s1433_s6, %s1433_s6 }
  0x33   : > { %p1222_p5 = scmp.ne.s32.totalorder %s1433_s6, %s1221_s28  ;;  %p1230_p0 = scmp.lt.s32.totalorder %s1221_s28, %s1221_s28 }
  0x35   : > { %p1224_p7 = pnand %p1222_p5, %p1182_p13  ;;  %p1231_p2 = por %p1230_p0, %p1229_p12 }
  0x37   : > { %p1225_p9 = pneg %p1224_p7 }
  0x39   : > { %p1232_p1 = pnand %p1231_p2, %p1225_p9 }
  0x3b   : > { %1235 = shalt.err (!%p1232_p1)
}
  0x3c   : > { %1045 = dma.hbm_to_vmem [thread:$0]  (!%p1429_p11), %s1698_s3, 1024, %s1433_s6, [#allocation6], %s1340_s15, %s1340_s15, %s1341_s16  }
  0x3d   : > { %s1488_s14 = sadd.s32 1, %s1336_s21   ;;  %s29_s29 = sadd.s32 1, %s1332_s20 }
  0x3e   : > { %s26_s17 = ssub.s32 %s1336_s21, %s1488_s14  ;;  %p36_p13 = scmp.ne.s32.totalorder %s1332_s20, %s1328_s19 }
  0x3f   : > { %p27_p6 = scmp.eq.s32.totalorder %s26_s17, 0  ;;  %p37_p10 = scmp.eq.s32.totalorder %s1336_s21, 0 }
  0x40   : > { %p1708_p3 = scmp.eq.s32.totalorder %s1399_s22, 1  ;;  %p1056_p7 = scmp.lt.s32.totalorder %s1336_s21, 2 }
  0x41   : > { %s1504_s27 = scalar_select %p27_p6, %s1332_s20, %s29_s29  }
  0x42   : > { %p1498_p5 = por %p1708_p3, %p36_p13  ;;  %p38_p9 = por %p37_p10, %p36_p13 }
  0x43   : > { %s208_s30 = sand.u32 1, %s1332_s20   ;;  %s929_s6 = sshll.u32 %s1336_s21, 11 }
  0x44   : > { %s1709_s23 = scalar_select %p1498_p5, 1, 0 }
  0x45   : > { %s898_s7 = sshll.u32 %s208_s30, 7  ;;  %s1511_s8 = scalar_lea.hbm %s1695_s0, %s929_s6 }
  0x46   : > { %s212_s9 = scalar_lea.vmem [#allocation2], %s898_s7  ;;  %p1515_p11 = pnand %p1056_p7, %p38_p9 }
  0x47   : > { %s219_s10 = sshll.u32 %s212_s9, 4  ;;  %s1519_s28 = scalar_lea.sflag [#allocation3], %s208_s30  ;;  %s1513_s10 = int_to_ptr.vmem [resolvable:$true] %s219_s10 }
  0x48   : > { %s1236_s12 = scalar_lea.hbm %s1511_s8, 2048  ;;  %p1238_p0 = pneg %p1515_p11 }
  0x49   : > { %p1237_p12 = scmp.ne.s32.totalorder %s1511_s8, %s1236_s12  ;;  %s1241_s17 = scalar_lea.hbm %s1695_s0, 4096 }
  0x4a   : > { %p1242_p13 = scmp.lt.u32.totalorder %s1511_s8, %s1695_s0  ;;  %p1243_p6 = scmp.lt.u32.totalorder %s1241_s17, %s1236_s12 }
  0x4b   : > { %p1239_p2 = pnand %p1238_p0, %p1237_p12  ;;  %p1245_p3 = scmp.lt.u32.totalorder %s1236_s12, %s1511_s8 }
  0x4c   : > { %p1244_p10 = por %p1243_p6, %p1242_p13 }
  0x4d   : > { %p1240_p1 = pneg %p1239_p2 }
  0x4e   : > { %p1246_p7 = por %p1245_p3, %p1244_p10 }
  0x50   : > { %p1247_p9 = pnand %p1246_p7, %p1240_p1 }
  0x52   : > { %1250 = shalt.err (!%p1247_p9)
}
  0x53   : > { %s1251_s30 = scalar_lea.vmem %s1513_s10, 2048  ;;  %s1342_s15 = smov [#allocation2]  }
  0x54   : > { %p1252_p12 = scmp.ne.s32.totalorder %s1513_s10, %s1251_s30  ;;  %s1256_s16 = sshll.u32 %s1342_s15, 4  ;;  %s1257_s16 = int_to_ptr.vmem [resolvable:$false] %s1256_s16 }
  0x55   : > { %s1258_s9 = scalar_lea.vmem %s1257_s16, 4096  ;;  %p1259_p4 = scmp.lt.s32.totalorder %s1513_s10, %s1257_s16 }
  0x56   : > { %p1254_p2 = pnand %p1252_p12, %p1238_p0  ;;  %p1260_p13 = scmp.lt.s32.totalorder %s1258_s9, %s1251_s30 }
  0x58   : > { %p1255_p5 = pneg %p1254_p2  ;;  %p1261_p6 = por %p1260_p13, %p1259_p4 }
  0x5a   : > { %p1262_p10 = pnand %p1261_p6, %p1255_p5 }
  0x5c   : > { %1265 = shalt.err (!%p1262_p10)
}
  0x5d   : > { %s1343_s12 = smov 128   ;;  %s1344_s13 = smov 8  }
  0x5e   : > { %1049 = dma.hbm_to_vmem [thread:$0]  (!%p1515_p11), %s1511_s8, 2048, %s1513_s10, %s1519_s28, %s1343_s12, %s1343_s12, %s1344_s13  }
  0x5f   : > { %231 = sbr.rel (%p1418_p8) target bundleno = 649 (0x289), region = 40  ;;  %s1550_s29 = sand.u32 (!%p1418_p8), 1, %s1328_s19  }
  0x60   : > { %s902_s17 = sshll.u32 (!%p1418_p8), %s1550_s29, 7  ;;  %s234_s7 = scalar_lea.sflag (!%p1418_p8), [#allocation3], %s1550_s29 }
  0x61   : > { %s1556_s6 = scalar_lea.vmem (!%p1418_p8), [#allocation2], %s902_s17  ;;  %p1711_p4 = scmp.ne.s32.totalorder (!%p1418_p8), %s1704_s24, 0 }
  0x66   : > { %1311 = dma.done.wait (%p1711_p4), %s234_s7, 2048  }
  0x67   : > { %1313 = vsyncadd (%p1711_p4), %s234_s7, 4294965248  ;;  %p1712_p5 = scmp.eq.s32.totalorder %s1399_s22, 0 }
  0x69   : > { %1315 = dma.done.wait (%p1712_p5), [#allocation6], 2048   ;;  %p1713_p8 = pmov %p1712_p5 }
  0x6a   : > { %v1100_v0 = vld [vmem:[#allocation5] sm:$0xff]   ;;  %v1101_v1 = vld [vmem:[#allocation5 + $0x8] sm:$0xff]   ;;  %v1102_v2 = vld [vmem:[#allocation5 + $0x10] sm:$0xff]   ;;  %s1621_s11 = scalar_lea.vmem [#allocation8], %s902_s17  ;;  %s930_s28 = sshll.u32 %s1399_s22, 11 }
  0x6b   : > { %1317 = vsyncadd (%p1713_p8), [#allocation6], 4294965248  ;;  %963 = vmatprep.subr.bf16.mxu0 %v1100_v0  ;;  %v1103_v3 = vld [vmem:[#allocation5 + $0x18] sm:$0xff]   ;;  %v275_v4 = vld [vmem:[%s1556_s6] sm:$0xff]  ;;  %s801_s30 = sshll.u32 %s1621_s11, 4  ;;  %s1646_s9 = scalar_lea.hbm %s1700_s5, %s930_s28  ;;  %s1648_s30 = int_to_ptr.vmem [resolvable:$true] %s801_s30 }
  0x6c   : > { %964 = vmatpush3.bf16.msra.mxu0 %v1100_v0  ;;  %v276_v5 = vld [vmem:[%s1556_s6 + $0x8] sm:$0xff]  ;;  %v1104_v7 = vld [vmem:[#allocation5 + $0x20] sm:$0xff]   ;;  %v1106_v11 = vld [vmem:[#allocation5 + $0x30] sm:$0xff]   ;;  %s788_s22 = scalar_lea.sflag [#allocation4], %s1550_s29  ;;  %s1266_s12 = scalar_lea.vmem %s1648_s30, 2048 }
  0x6d   : > { %965 = vmatprep.subr.bf16.mxu0 %v1101_v1  ;;  %v291_v6 = vpack.c.bf16 %v276_v5, %v275_v4  ;;  %v1105_v8 = vld [vmem:[#allocation5 + $0x28] sm:$0xff]   ;;  %v1108_v9 = vld [vmem:[#allocation7] sm:$0xff]   ;;  %v1107_v12 = vld [vmem:[#allocation5 + $0x38] sm:$0xff]   ;;  %p1267_p11 = scmp.ne.s32.totalorder %s1648_s30, %s1266_s12  ;;  %p1714_p0 = scmp.ne.s32.totalorder %s1709_s23, 0 }
  0x6e   : > { %v1109_v10 = vld [vmem:[#allocation7 + $0x8] sm:$0xff]   ;;  %995 = vmatprep.subr.bf16.mxu1 %v1108_v9  ;;  %v277_v13 = vld [vmem:[%s1556_s6 + $0x10] sm:$0xff]  ;;  %v278_v14 = vld [vmem:[%s1556_s6 + $0x18] sm:$0xff]  ;;  %s1345_s13 = smov [#allocation8]  }
  0x6f   : > { %979 = vmatprep.mubr.bf16.mxu0 %v291_v6  ;;  %996 = vmatpush3.bf16.msra.mxu1 %v1108_v9  ;;  %v279_v15 = vld [vmem:[%s1556_s6 + $0x20] sm:$0xff]  ;;  %v280_v16 = vld [vmem:[%s1556_s6 + $0x28] sm:$0xff]  ;;  %v292_v17 = vpack.c.bf16 %v278_v14, %v277_v13  ;;  %v281_v19 = vld [vmem:[%s1556_s6 + $0x30] sm:$0xff]  ;;  %p1268_p1 = pnand %p1267_p11, %p1714_p0  ;;  %s1270_s17 = sshll.u32 %s1345_s13, 4  ;;  %s1271_s17 = int_to_ptr.vmem [resolvable:$false] %s1270_s17 }
  0x70   : > { %966 = vmatpush3.bf16.msra.mxu0 %v1101_v1  ;;  %997 = vmatprep.subr.bf16.mxu1 %v1109_v10  ;;  %v293_v18 = vpack.c.bf16 %v280_v16, %v279_v15  ;;  %v282_v20 = vld [vmem:[%s1556_s6 + $0x38] sm:$0xff]  ;;  %v283_v21 = vld [vmem:[%s1556_s6 + $0x40] sm:$0xff]  ;;  %v284_v22 = vld [vmem:[%s1556_s6 + $0x48] sm:$0xff]  ;;  %s1272_s7 = scalar_lea.vmem %s1271_s17, 4096  ;;  %p1273_p7 = scmp.lt.s32.totalorder %s1648_s30, %s1271_s17 }
  0x71   : > { %967 = vmatprep.subr.bf16.mxu0 %v1102_v2  ;;  %v294_v23 = vpack.c.bf16 %v282_v20, %v281_v19  ;;  %v295_v24 = vpack.c.bf16 %v284_v22, %v283_v21  ;;  %v285_v25 = vld [vmem:[%s1556_s6 + $0x50] sm:$0xff]  ;;  %v286_v26 = vld [vmem:[%s1556_s6 + $0x58] sm:$0xff]  ;;  %v287_v27 = vld [vmem:[%s1556_s6 + $0x60] sm:$0xff]  ;;  %p1269_p3 = pneg %p1268_p1  ;;  %p1274_p9 = scmp.lt.s32.totalorder %s1272_s7, %s1266_s12 }
  0x72   : > { %v288_v28 = vld [vmem:[%s1556_s6 + $0x68] sm:$0xff]  ;;  %v296_v29 = vpack.c.bf16 %v286_v26, %v285_v25  ;;  %v289_v31 = vld [vmem:[%s1556_s6 + $0x70] sm:$0xff]  ;;  %v290_v32 = vld [vmem:[%s1556_s6 + $0x78] sm:$0xff] }
  0x73   : > { %998 = vmatpush3.bf16.msra.mxu1 %v1109_v10  ;;  %v297_v30 = vpack.c.bf16 %v288_v28, %v287_v27  ;;  %v298_v33 = vpack.c.bf16 %v290_v32, %v289_v31  ;;  %v1110_v34 = vld [vmem:[#allocation7 + $0x10] sm:$0xff]   ;;  %v1111_v35 = vld [vmem:[#allocation7 + $0x18] sm:$0xff]   ;;  %v1112_v36 = vld [vmem:[#allocation7 + $0x20] sm:$0xff]   ;;  %p1275_p12 = por %p1274_p9, %p1273_p7 }
  0x74   : > { %968 = vmatpush3.bf16.msra.mxu0 %v1102_v2  ;;  %999 = vmatprep.subr.bf16.mxu1 %v1110_v34  ;;  %v1113_v37 = vld [vmem:[#allocation7 + $0x28] sm:$0xff]   ;;  %v1114_v38 = vld [vmem:[#allocation7 + $0x30] sm:$0xff]   ;;  %v1115_v39 = vld [vmem:[#allocation7 + $0x38] sm:$0xff]  }
  0x75   : > { %969 = vmatprep.subr.bf16.mxu0 %v1103_v3  ;;  %v1585_v40 = vld [vmem:[%s1697_s2] ss:$0 sm:$0xff]  ;;  %p1276_p2 = pnand %p1275_p12, %p1269_p3 }
  0x77   : > { %1000 = vmatpush3.bf16.msra.mxu1 %v1110_v34 }
  0x78   : > { %970 = vmatpush3.bf16.msra.mxu0 %v1103_v3  ;;  %1001 = vmatprep.subr.bf16.mxu1 %v1111_v35 }
  0x79   : > { %971 = vmatprep.subr.bf16.mxu0 %v1104_v7 }
  0x7b   : > { %1002 = vmatpush3.bf16.msra.mxu1 %v1111_v35 }
  0x7c   : > { %972 = vmatpush3.bf16.msra.mxu0 %v1104_v7  ;;  %1003 = vmatprep.subr.bf16.mxu1 %v1112_v36 }
  0x7d   : > { %973 = vmatprep.subr.bf16.mxu0 %v1105_v8 }
  0x7f   : > { %1004 = vmatpush3.bf16.msra.mxu1 %v1112_v36 }
  0x80   : > { %974 = vmatpush3.bf16.msra.mxu0 %v1105_v8  ;;  %1005 = vmatprep.subr.bf16.mxu1 %v1113_v37 }
  0x81   : > { %975 = vmatprep.subr.bf16.mxu0 %v1106_v11 }
  0x83   : > { %1006 = vmatpush3.bf16.msra.mxu1 %v1113_v37 }
  0x84   : > { %976 = vmatpush3.bf16.msra.mxu0 %v1106_v11  ;;  %1007 = vmatprep.subr.bf16.mxu1 %v1114_v38 }
  0x85   : > { %977 = vmatprep.subr.bf16.mxu0 %v1107_v12 }
  0x87   : > { %1008 = vmatpush3.bf16.msra.mxu1 %v1114_v38 }
  0x88   : > { %978 = vmatpush3.bf16.msra.mxu0 %v1107_v12  ;;  %1009 = vmatprep.subr.bf16.mxu1 %v1115_v39 }
  0x8b   : > { %980 = vmatmul.mubr.bf16.vlgmr.msra.gmra.mrb[0].mxu0 %v292_v17  ;;  %1010 = vmatpush3.bf16.msra.mxu1 %v1115_v39 }
  0x8c   : > { %983 = vmatprep.mubr.bf16.mxu0 %v293_v18 }
  0x93   : > { %984 = vmatmul.mubr.bf16.gmra.mrb[4].mxu0 %v294_v23 }
  0x94   : > { %987 = vmatprep.mubr.bf16.mxu0 %v295_v24 }
  0x9b   : > { %988 = vmatmul.mubr.bf16.gmra.mrb[8].mxu0 %v296_v29 }
  0x9c   : > { %991 = vmatprep.mubr.bf16.mxu0 %v297_v30 }
  0xa3   : > { %992 = vmatmul.mubr.bf16.gmra.mrb[12].mxu0 %v298_v33 }
 0x15e   : > { %v981_v41 = vpop.f32.mrb[0].mxu0 }
 0x15f   : > { %v413_v42 = vadd.f32 %v981_v41, %v1585_v40  ;;  %v404_v43 = vpop.f32.mrb[1].mxu0 }
 0x160   : > { %v405_v44 = vadd.f32 %v1585_v40, %v404_v43  ;;  %v982_v45 = vpop.f32.mrb[2].mxu0 }
 0x161   : > { %v469_v46 = vmul.f32 0.5, %v413_v42  ;;  %v416_v47 = vadd.f32 %v982_v45, %v1585_v40  ;;  %v407_v48 = vpop.f32.mrb[3].mxu0 }
 0x162   : > { %v467_v49 = vmul.f32 0.5, %v405_v44  ;;  %v408_v50 = vadd.f32 %v1585_v40, %v407_v48 }
 0x163   : > { %1116 = vtanh.f32 %v469_v46  ;;  %v470_v51 = vmul.f32 0.5, %v416_v47 }
 0x164   : > { %1118 = vtanh.f32 %v467_v49  ;;  %v468_v52 = vmul.f32 0.5, %v408_v50 }
 0x165   : > { %1120 = vtanh.f32 %v470_v51 }
 0x166   : > { %1122 = vtanh.f32 %v468_v52  ;;  %v985_v53 = vpop.f32.mrb[4].mxu0 }
 0x167   : > { %v429_v54 = vadd.f32 %v985_v53, %v1585_v40  ;;  %v420_v55 = vpop.f32.mrb[5].mxu0 }
 0x168   : > { %v421_v56 = vadd.f32 %v1585_v40, %v420_v55  ;;  %v986_v57 = vpop.f32.mrb[6].mxu0 }
 0x169   : > { %v473_v58 = vmul.f32 0.5, %v429_v54  ;;  %v432_v59 = vadd.f32 %v986_v57, %v1585_v40  ;;  %v423_v60 = vpop.f32.mrb[7].mxu0 }
 0x16a   : > { %v471_v61 = vmul.f32 0.5, %v421_v56  ;;  %v424_v62 = vadd.f32 %v1585_v40, %v423_v60 }
 0x16b   : > { %1124 = vtanh.f32 %v473_v58  ;;  %v474_v63 = vmul.f32 0.5, %v432_v59 }
 0x16c   : > { %1126 = vtanh.f32 %v471_v61  ;;  %v472_v0 = vmul.f32 0.5, %v424_v62 }
 0x16d   : > { %v1117_v1 = vpop.eup %1116  ;;  %1128 = vtanh.f32 %v474_v63 }
 0x16e   : > { %v1119_v2 = vpop.eup %1118  ;;  %v501_v3 = vmul.f32 0.5, %v1117_v1  ;;  %1130 = vtanh.f32 %v472_v0  ;;  %v989_v4 = vpop.f32.mrb[8].mxu0 }
 0x16f   : > { %v1121_v5 = vpop.eup %1120  ;;  %v445_v6 = vadd.f32 %v989_v4, %v1585_v40  ;;  %v436_v7 = vpop.f32.mrb[9].mxu0  ;;  %v499_v8 = vmul.f32 0.5, %v1119_v2 }
 0x170   : > { %v1123_v9 = vpop.eup %1122  ;;  %v502_v10 = vmul.f32 0.5, %v1121_v5  ;;  %v437_v11 = vadd.f32 %v1585_v40, %v436_v7  ;;  %v990_v12 = vpop.f32.mrb[10].mxu0  ;;  %v517_v17 = vadd.f32 0.5, %v501_v3 }
 0x171   : > { %v477_v13 = vmul.f32 0.5, %v445_v6  ;;  %v448_v14 = vadd.f32 %v990_v12, %v1585_v40  ;;  %v439_v15 = vpop.f32.mrb[11].mxu0  ;;  %v500_v16 = vmul.f32 0.5, %v1123_v9  ;;  %v515_v22 = vadd.f32 0.5, %v499_v8 }
 0x172   : > { %v518_v18 = vadd.f32 0.5, %v502_v10  ;;  %v475_v19 = vmul.f32 0.5, %v437_v11  ;;  %v440_v20 = vadd.f32 %v1585_v40, %v439_v15 }
 0x173   : > { %1132 = vtanh.f32 %v477_v13  ;;  %v478_v21 = vmul.f32 0.5, %v448_v14  ;;  %v516_v23 = vadd.f32 0.5, %v500_v16 }
 0x174   : > { %1134 = vtanh.f32 %v475_v19  ;;  %v476_v24 = vmul.f32 0.5, %v440_v20  ;;  %v532_v25 = vpack.c.bf16 %v518_v18, %v517_v17  ;;  %v1606_v17 = vld [vmem:[%s1699_s4] ss:$0 sm:$0xff] }
 0x175   : > { %v1125_v26 = vpop.eup %1124  ;;  %1136 = vtanh.f32 %v478_v21  ;;  %v531_v27 = vpack.c.bf16 %v516_v23, %v515_v22 }
 0x176   : > { %v1127_v28 = vpop.eup %1126  ;;  %v505_v29 = vmul.f32 0.5, %v1125_v26  ;;  %1138 = vtanh.f32 %v476_v24  ;;  %v993_v30 = vpop.f32.mrb[12].mxu0 }
 0x177   : > { %v1129_v31 = vpop.eup %1128  ;;  %v503_v32 = vmul.f32 0.5, %v1127_v28  ;;  %v461_v33 = vadd.f32 %v993_v30, %v1585_v40  ;;  %v452_v34 = vpop.f32.mrb[13].mxu0  ;;  %1011 = vmatprep.mubr.bf16.mxu1 %v531_v27 }
 0x178   : > { %v1131_v35 = vpop.eup %1130  ;;  %v506_v36 = vmul.f32 0.5, %v1129_v31  ;;  %v453_v37 = vadd.f32 %v1585_v40, %v452_v34  ;;  %v994_v38 = vpop.f32.mrb[14].mxu0  ;;  %1012 = vmatmul.mubr.bf16.vlgmr.msra.gmra.mrb[0].mxu1 %v532_v25  ;;  %v521_v44 = vadd.f32 0.5, %v505_v29 }
 0x179   : > { %v504_v39 = vmul.f32 0.5, %v1131_v35  ;;  %v481_v41 = vmul.f32 0.5, %v461_v33  ;;  %v464_v42 = vadd.f32 %v994_v38, %v1585_v40  ;;  %v455_v43 = vpop.f32.mrb[15].mxu0  ;;  %v519_v48 = vadd.f32 0.5, %v503_v32 }
 0x17a   : > { %v522_v45 = vadd.f32 0.5, %v506_v36  ;;  %v479_v46 = vmul.f32 0.5, %v453_v37  ;;  %v456_v47 = vadd.f32 %v1585_v40, %v455_v43 }
 0x17b   : > { %v520_v49 = vadd.f32 0.5, %v504_v39  ;;  %1140 = vtanh.f32 %v481_v41  ;;  %v482_v50 = vmul.f32 0.5, %v464_v42 }
 0x17c   : > { %1142 = vtanh.f32 %v479_v46  ;;  %v480_v51 = vmul.f32 0.5, %v456_v47  ;;  %v534_v52 = vpack.c.bf16 %v522_v45, %v521_v44 }
 0x17d   : > { %v1133_v53 = vpop.eup %1132  ;;  %1144 = vtanh.f32 %v482_v50  ;;  %v533_v54 = vpack.c.bf16 %v520_v49, %v519_v48 }
 0x17e   : > { %v1135_v55 = vpop.eup %1134  ;;  %v509_v56 = vmul.f32 0.5, %v1133_v53  ;;  %1146 = vtanh.f32 %v480_v51 }
 0x17f   : > { %v1137_v57 = vpop.eup %1136  ;;  %v507_v58 = vmul.f32 0.5, %v1135_v55  ;;  %1015 = vmatprep.mubr.bf16.mxu1 %v533_v54 }
 0x180   : > { %v1139_v59 = vpop.eup %1138  ;;  %v510_v60 = vmul.f32 0.5, %v1137_v57  ;;  %1016 = vmatmul.mubr.bf16.gmra.mrb[4].mxu1 %v534_v52  ;;  %v525_v61 = vadd.f32 0.5, %v509_v56 }
 0x181   : > { %v508_v40 = vmul.f32 0.5, %v1139_v59  ;;  %v523_v63 = vadd.f32 0.5, %v507_v58 }
 0x182   : > { %v526_v62 = vadd.f32 0.5, %v510_v60 }
 0x183   : > { %v524_v0 = vadd.f32 0.5, %v508_v40 }
 0x184   : > { %v536_v1 = vpack.c.bf16 %v526_v62, %v525_v61 }
 0x185   : > { %v1141_v2 = vpop.eup %1140  ;;  %v535_v3 = vpack.c.bf16 %v524_v0, %v523_v63 }
 0x186   : > { %v1143_v4 = vpop.eup %1142  ;;  %v513_v5 = vmul.f32 0.5, %v1141_v2 }
 0x187   : > { %v1145_v6 = vpop.eup %1144  ;;  %v511_v7 = vmul.f32 0.5, %v1143_v4  ;;  %1019 = vmatprep.mubr.bf16.mxu1 %v535_v3 }
 0x188   : > { %v1147_v8 = vpop.eup %1146  ;;  %v514_v9 = vmul.f32 0.5, %v1145_v6  ;;  %1020 = vmatmul.mubr.bf16.gmra.mrb[8].mxu1 %v536_v1  ;;  %v529_v11 = vadd.f32 0.5, %v513_v5 }
 0x189   : > { %v512_v10 = vmul.f32 0.5, %v1147_v8  ;;  %v527_v13 = vadd.f32 0.5, %v511_v7 }
 0x18a   : > { %v530_v12 = vadd.f32 0.5, %v514_v9 }
 0x18b   : > { %v528_v14 = vadd.f32 0.5, %v512_v10 }
 0x18c   : > { %v538_v15 = vpack.c.bf16 %v530_v12, %v529_v11 }
 0x18d   : > { %v537_v16 = vpack.c.bf16 %v528_v14, %v527_v13 }
 0x18f   : > { %1023 = vmatprep.mubr.bf16.mxu1 %v537_v16 }
 0x190   : > { %1024 = vmatmul.mubr.bf16.gmra.mrb[12].mxu1 %v538_v15 }
 0x24b   : > { %v1013_v18 = vpop.f32.mrb[0].mxu1 }
 0x24c   : > { %v653_v19 = vadd.f32 %v1013_v18, %v1606_v17  ;;  %v644_v20 = vpop.f32.mrb[1].mxu1 }
 0x24d   : > { %v645_v21 = vadd.f32 %v1606_v17, %v644_v20  ;;  %v1014_v22 = vpop.f32.mrb[2].mxu1 }
 0x24e   : > { %v709_v23 = vmul.f32 0.5, %v653_v19  ;;  %v656_v24 = vadd.f32 %v1014_v22, %v1606_v17  ;;  %v647_v25 = vpop.f32.mrb[3].mxu1 }
 0x24f   : > { %v707_v26 = vmul.f32 0.5, %v645_v21  ;;  %v648_v27 = vadd.f32 %v1606_v17, %v647_v25 }
 0x250   : > { %1148 = vtanh.f32 %v709_v23  ;;  %v710_v28 = vmul.f32 0.5, %v656_v24 }
 0x251   : > { %1150 = vtanh.f32 %v707_v26  ;;  %v708_v29 = vmul.f32 0.5, %v648_v27 }
 0x252   : > { %1152 = vtanh.f32 %v710_v28 }
 0x253   : > { %1154 = vtanh.f32 %v708_v29  ;;  %v1017_v30 = vpop.f32.mrb[4].mxu1 }
 0x254   : > { %v669_v31 = vadd.f32 %v1017_v30, %v1606_v17  ;;  %v660_v32 = vpop.f32.mrb[5].mxu1 }
 0x255   : > { %v661_v33 = vadd.f32 %v1606_v17, %v660_v32  ;;  %v1018_v34 = vpop.f32.mrb[6].mxu1 }
 0x256   : > { %v713_v35 = vmul.f32 0.5, %v669_v31  ;;  %v672_v36 = vadd.f32 %v1018_v34, %v1606_v17  ;;  %v663_v37 = vpop.f32.mrb[7].mxu1 }
 0x257   : > { %v711_v38 = vmul.f32 0.5, %v661_v33  ;;  %v664_v39 = vadd.f32 %v1606_v17, %v663_v37 }
 0x258   : > { %1156 = vtanh.f32 %v713_v35  ;;  %v714_v41 = vmul.f32 0.5, %v672_v36 }
 0x259   : > { %1158 = vtanh.f32 %v711_v38  ;;  %v712_v42 = vmul.f32 0.5, %v664_v39 }
 0x25a   : > { %v1149_v43 = vpop.eup %1148  ;;  %1160 = vtanh.f32 %v714_v41 }
 0x25b   : > { %v1151_v44 = vpop.eup %1150  ;;  %v741_v45 = vmul.f32 0.5, %v1149_v43  ;;  %1162 = vtanh.f32 %v712_v42  ;;  %v1021_v46 = vpop.f32.mrb[8].mxu1 }
 0x25c   : > { %v1153_v47 = vpop.eup %1152  ;;  %v739_v48 = vmul.f32 0.5, %v1151_v44  ;;  %v685_v49 = vadd.f32 %v1021_v46, %v1606_v17  ;;  %v676_v50 = vpop.f32.mrb[9].mxu1 }
 0x25d   : > { %v1155_v51 = vpop.eup %1154  ;;  %v757_v52 = vadd.f32 0.5, %v741_v45  ;;  %v742_v53 = vmul.f32 0.5, %v1153_v47  ;;  %v677_v54 = vadd.f32 %v1606_v17, %v676_v50  ;;  %v1022_v55 = vpop.f32.mrb[10].mxu1 }
 0x25e   : > { %v755_v56 = vadd.f32 0.5, %v739_v48  ;;  %v740_v57 = vmul.f32 0.5, %v1155_v51  ;;  %v717_v58 = vmul.f32 0.5, %v685_v49  ;;  %v688_v59 = vadd.f32 %v1022_v55, %v1606_v17  ;;  %v679_v60 = vpop.f32.mrb[11].mxu1 }
 0x25f   : > { %773 = vst [vmem:[%s1621_s11 + $0x10] sm:$0xff] %v757_v52  ;;  %v758_v40 = vadd.f32 0.5, %v742_v53  ;;  %v715_v61 = vmul.f32 0.5, %v677_v54  ;;  %v680_v62 = vadd.f32 %v1606_v17, %v679_v60 }
 0x260   : > { %771 = vst [vmem:[%s1621_s11] sm:$0xff] %v755_v56  ;;  %v756_v63 = vadd.f32 0.5, %v740_v57  ;;  %1164 = vtanh.f32 %v717_v58  ;;  %v718_v0 = vmul.f32 0.5, %v688_v59 }
 0x261   : > { %774 = vst [vmem:[%s1621_s11 + $0x18] sm:$0xff] %v758_v40  ;;  %1166 = vtanh.f32 %v715_v61  ;;  %v716_v1 = vmul.f32 0.5, %v680_v62 }
 0x262   : > { %v1157_v2 = vpop.eup %1156  ;;  %772 = vst [vmem:[%s1621_s11 + $0x8] sm:$0xff] %v756_v63  ;;  %1168 = vtanh.f32 %v718_v0 }
 0x263   : > { %v1159_v3 = vpop.eup %1158  ;;  %v745_v4 = vmul.f32 0.5, %v1157_v2  ;;  %1170 = vtanh.f32 %v716_v1  ;;  %v1025_v5 = vpop.f32.mrb[12].mxu1 }
 0x264   : > { %v1161_v6 = vpop.eup %1160  ;;  %v743_v7 = vmul.f32 0.5, %v1159_v3  ;;  %v701_v8 = vadd.f32 %v1025_v5, %v1606_v17  ;;  %v692_v9 = vpop.f32.mrb[13].mxu1 }
 0x265   : > { %v1163_v10 = vpop.eup %1162  ;;  %v761_v11 = vadd.f32 0.5, %v745_v4  ;;  %v746_v12 = vmul.f32 0.5, %v1161_v6  ;;  %v693_v13 = vadd.f32 %v1606_v17, %v692_v9  ;;  %v1026_v14 = vpop.f32.mrb[14].mxu1 }
 0x266   : > { %v759_v15 = vadd.f32 0.5, %v743_v7  ;;  %v744_v16 = vmul.f32 0.5, %v1163_v10  ;;  %v721_v18 = vmul.f32 0.5, %v701_v8  ;;  %v704_v19 = vadd.f32 %v1026_v14, %v1606_v17  ;;  %v695_v20 = vpop.f32.mrb[15].mxu1 }
 0x267   : > { %777 = vst [vmem:[%s1621_s11 + $0x30] sm:$0xff] %v761_v11  ;;  %v762_v21 = vadd.f32 0.5, %v746_v12  ;;  %v719_v22 = vmul.f32 0.5, %v693_v13  ;;  %v696_v23 = vadd.f32 %v1606_v17, %v695_v20 }
 0x268   : > { %775 = vst [vmem:[%s1621_s11 + $0x20] sm:$0xff] %v759_v15  ;;  %v760_v24 = vadd.f32 0.5, %v744_v16  ;;  %1172 = vtanh.f32 %v721_v18  ;;  %v722_v25 = vmul.f32 0.5, %v704_v19 }
 0x269   : > { %778 = vst [vmem:[%s1621_s11 + $0x38] sm:$0xff] %v762_v21  ;;  %1174 = vtanh.f32 %v719_v22  ;;  %v720_v26 = vmul.f32 0.5, %v696_v23 }
 0x26a   : > { %v1165_v27 = vpop.eup %1164  ;;  %776 = vst [vmem:[%s1621_s11 + $0x28] sm:$0xff] %v760_v24  ;;  %1176 = vtanh.f32 %v722_v25 }
 0x26b   : > { %v1167_v28 = vpop.eup %1166  ;;  %v749_v29 = vmul.f32 0.5, %v1165_v27  ;;  %1178 = vtanh.f32 %v720_v26 }
 0x26c   : > { %v1169_v30 = vpop.eup %1168  ;;  %v747_v31 = vmul.f32 0.5, %v1167_v28 }
 0x26d   : > { %v1171_v17 = vpop.eup %1170  ;;  %v765_v32 = vadd.f32 0.5, %v749_v29  ;;  %v750_v33 = vmul.f32 0.5, %v1169_v30 }
 0x26e   : > { %v763_v34 = vadd.f32 0.5, %v747_v31  ;;  %v748_v35 = vmul.f32 0.5, %v1171_v17 }
 0x26f   : > { %781 = vst [vmem:[%s1621_s11 + $0x50] sm:$0xff] %v765_v32  ;;  %v766_v36 = vadd.f32 0.5, %v750_v33 }
 0x270   : > { %779 = vst [vmem:[%s1621_s11 + $0x40] sm:$0xff] %v763_v34  ;;  %v764_v37 = vadd.f32 0.5, %v748_v35 }
 0x271   : > { %782 = vst [vmem:[%s1621_s11 + $0x58] sm:$0xff] %v766_v36 }
 0x272   : > { %v1173_v38 = vpop.eup %1172  ;;  %780 = vst [vmem:[%s1621_s11 + $0x48] sm:$0xff] %v764_v37 }
 0x273   : > { %v1175_v39 = vpop.eup %1174  ;;  %v753_v41 = vmul.f32 0.5, %v1173_v38 }
 0x274   : > { %v1177_v42 = vpop.eup %1176  ;;  %v751_v43 = vmul.f32 0.5, %v1175_v39 }
 0x275   : > { %v1179_v44 = vpop.eup %1178  ;;  %v769_v45 = vadd.f32 0.5, %v753_v41  ;;  %v754_v46 = vmul.f32 0.5, %v1177_v42 }
 0x276   : > { %v767_v47 = vadd.f32 0.5, %v751_v43  ;;  %v752_v48 = vmul.f32 0.5, %v1179_v44 }
 0x277   : > { %785 = vst [vmem:[%s1621_s11 + $0x70] sm:$0xff] %v769_v45  ;;  %v770_v49 = vadd.f32 0.5, %v754_v46 }
 0x278   : > { %783 = vst [vmem:[%s1621_s11 + $0x60] sm:$0xff] %v767_v47  ;;  %v768_v50 = vadd.f32 0.5, %v752_v48 }
 0x279   : > { %786 = vst [vmem:[%s1621_s11 + $0x78] sm:$0xff] %v770_v49 }
 0x27a   : > { %784 = vst [vmem:[%s1621_s11 + $0x68] sm:$0xff] %v768_v50 }
 0x27b   : > { %1279 = shalt.err (!%p1276_p2)
}
 0x27c   : > { %s1280_s6 = scalar_lea.hbm %s1646_s9, 2048  ;;  %s1284_s8 = scalar_lea.hbm %s1700_s5, 4096 }
 0x27d   : > { %p1281_p13 = scmp.ne.s32.totalorder %s1646_s9, %s1280_s6  ;;  %p1285_p4 = scmp.lt.u32.totalorder %s1646_s9, %s1700_s5 }
 0x27e   : > { %p1286_p5 = scmp.lt.u32.totalorder %s1284_s8, %s1280_s6  ;;  %p1288_p11 = scmp.lt.u32.totalorder %s1280_s6, %s1646_s9 }
 0x27f   : > { %p1282_p6 = pnand %p1281_p13, %p1714_p0 }
 0x280   : > { %p1287_p8 = por %p1286_p5, %p1285_p4 }
 0x281   : > { %p1283_p10 = pneg %p1282_p6 }
 0x282   : > { %p1289_p1 = por %p1288_p11, %p1287_p8 }
 0x284   : > { %p1290_p3 = pnand %p1289_p1, %p1283_p10 }
 0x286   : > { %1293 = shalt.err (!%p1290_p3)
}
 0x287   : > { %s1346_s28 = smov 128   ;;  %s1347_s15 = smov 8  }
 0x288   : > { %1037 = dma.vmem_to_hbm [thread:$0]  (%p1714_p0), %s1648_s30, 2048, %s1646_s9, %s788_s22, %s1346_s28, %s1346_s28, %s1347_s15  }
 0x289 PF: > { %s816_s16 = sand.u32 1, %s1324_s18   ;;  %p1715_p7 = scmp.ne.s32.totalorder %s1705_s25, 0 }
 0x28a   : > { %p1716_p9 = scmp.ge.s32.totalorder %s1336_s21, 2  ;;  %s817_s12 = scalar_lea.sflag [#allocation4], %s816_s16 }
 0x28c   : > { %p1051_p12 = pnand %p1716_p9, %p1715_p7 }
 0x28e   : > { %1319 = dma.done.wait (!%p1051_p12), %s817_s12, 2048  }
 0x28f   : > { %1321 = vsyncadd (!%p1051_p12), %s817_s12, 4294965248  ;;  %p19_p2 = scmp.ge.s32.totalorder %s1488_s14, 4   ;;  %s1717_s18 = smov %s1328_s19 }
 0x290   : > { %s1718_s19 = smov %s1332_s20  ;;  %s1719_s20 = smov %s1504_s27 }
 0x291   : > { %s1720_s21 = smov %s1488_s14  ;;  %21 = sbr.rel (!%p19_p2) target bundleno = 6 (0x6), region = 93 }
 0x298   :  { %822 = vsyncpa [#allocation3], 1 }
 0x299   :  { %824 = vsyncpa [#allocation3 + $0x1], 1 }
 0x29a   :  { %825 = vsyncpa [#allocation6], 1 }
 0x29b   :  { %826 = vsyncpa [#allocation4], 1 }
 0x29c   :  { %828 = vsyncpa [#allocation4 + $0x1], 1 }

</bundles_post_ra>
